<compile_context>
chip_gen: v5e
topology: v5e:2x2
jax: 0.10.0
libtpu: 0.0.40
codegen_flags: <defaults>
</compile_context>

<pallas_src>
import functools

import jax
import jax.numpy as jnp
from jax.experimental import pallas as pl
from jax.experimental.pallas import tpu as pltpu

# ---- model dims (small MLP autoencoder, consistent with lab09) ----
D_IN = 256    # input feature dim
H = 128       # hidden dim
Z = 32        # latent dim (as in the PyTorch model)
B = 8         # example batch

MAX_TILE = 512  # DMA-sized batch-tile cap for large batches (multiple of 8)


def autoencoder_kernel(x_ref,
                       w1_ref, b1_ref, w2_ref, b2_ref,   # encoder params
                       w3_ref, b3_ref, w4_ref, b4_ref,   # decoder params
                       o_ref):
    x = x_ref[...]  # already f32; no redundant cast

    # MXU gets bf16 operands, accumulation stays f32 (preferred_element_type).
    # Bias adds / ReLU stay f32 on the VPU (required on v5e, fine elsewhere).
    h = jnp.dot(x.astype(jnp.bfloat16), w1_ref[...],
                preferred_element_type=jnp.float32) + b1_ref[...]
    h = jnp.maximum(h, 0.0)

    z = jnp.dot(h.astype(jnp.bfloat16), w2_ref[...],
                preferred_element_type=jnp.float32) + b2_ref[...]
    z = jnp.maximum(z, 0.0)

    d = jnp.dot(z.astype(jnp.bfloat16), w3_ref[...],
                preferred_element_type=jnp.float32) + b3_ref[...]
    d = jnp.maximum(d, 0.0)

    y = jnp.dot(d.astype(jnp.bfloat16), w4_ref[...],
                preferred_element_type=jnp.float32) + b4_ref[...]

    # sigmoid(y) = 1 / (1 + exp(-y)): exp + approx reciprocal both on the EUP.
    o_ref[...] = pl.reciprocal(1.0 + jnp.exp(-y), approx=True).astype(o_ref.dtype)


def _round_up(n, m):
    return ((n + m - 1) // m) * m


@functools.partial(jax.jit, static_argnames=("tb",))
def _forward_impl(x_p, params, *, tb):
    w1, b1, w2, b2, w3, b3, w4, b4 = params
    b_pad, D = x_p.shape
    grid = (b_pad // tb,)

    def const(shape):
        # Parameter blocks: whole array, same block index every grid step.
        # Single-buffered: no re-DMA is needed across steps, so the default
        # double-buffering would only waste VMEM.
        return pl.BlockSpec(shape, lambda i: tuple(0 for _ in shape),
                            pipeline_mode=pl.Buffered(1))

    hdim = w1.shape[1]
    zdim = w2.shape[1]
    flops = 2 * b_pad * (D * hdim + hdim * zdim + zdim * hdim + hdim * D)
    bytes_accessed = (x_p.size * x_p.dtype.itemsize                      # input
                      + b_pad * D * x_p.dtype.itemsize                   # output
                      + sum(int(p.size) * p.dtype.itemsize for p in params))
    cost = pl.CostEstimate(flops=int(flops),
                           transcendentals=int(2 * b_pad * D),  # exp + recip
                           bytes_accessed=int(bytes_accessed))

    return pl.pallas_call(
        autoencoder_kernel,
        out_shape=jax.ShapeDtypeStruct((b_pad, D), x_p.dtype),
        grid_spec=pltpu.PrefetchScalarGridSpec(
            num_scalar_prefetch=0,
            grid=grid,
            in_specs=[
                pl.BlockSpec((tb, D), lambda i: (i, 0)),   # x tile
                const(w1.shape), const(b1.shape),
                const(w2.shape), const(b2.shape),
                const(w3.shape), const(b3.shape),
                const(w4.shape), const(b4.shape),
            ],
            out_specs=pl.BlockSpec((tb, D), lambda i: (i, 0)),
        ),
        compiler_params=pltpu.CompilerParams(
            # Shards batch tiles across v7x's two TensorCores when grid >= 2;
            # harmless no-op when the whole batch fits in one tile.
            dimension_semantics=("parallel",),
        ),
        cost_estimate=cost,
    )(x_p, w1, b1, w2, b2, w3, b3, w4, b4)


def autoencoder_forward(x, params):
    """Full forward pass. Pads the batch only up to the next multiple of 8."""
    Bx = x.shape[0]
    tb = min(MAX_TILE, _round_up(Bx, 8))   # 8-row tiles are legal (8,128) blocks
    b_pad = _round_up(Bx, tb)
    if b_pad != Bx:
        x = jnp.pad(x, ((0, b_pad - Bx), (0, 0)))
    out = _forward_impl(x, params, tb=tb)
    return out[:Bx] if b_pad != Bx else out


def init_params(key):
    """Deterministic init, mimicking nn.Linear's uniform(-1/sqrt(fan_in), ...)."""
    def linear(key, fan_in, fan_out):
        kw, kb = jax.random.split(key)
        bound = 1.0 / jnp.sqrt(fan_in)
        w = jax.random.uniform(kw, (fan_in, fan_out), jnp.float32, -bound, bound)
        b = jax.random.uniform(kb, (1, fan_out), jnp.float32, -bound, bound)
        return w, b

    k1, k2, k3, k4 = jax.random.split(key, 4)
    w1, b1 = linear(k1, D_IN, H)
    w2, b2 = linear(k2, H, Z)
    w3, b3 = linear(k3, Z, H)
    w4, b4 = linear(k4, H, D_IN)
    return (w1, b1, w2, b2, w3, b3, w4, b4)


def prepare_params(params):
    """bf16 weight storage (halves weight DMA); biases stay f32 (VPU path)."""
    w1, b1, w2, b2, w3, b3, w4, b4 = params
    bf16 = lambda w: w.astype(jnp.bfloat16)
    return (bf16(w1), b1, bf16(w2), b2, bf16(w3), b3, bf16(w4), b4)


def reference_forward(x, prepared):
    """Pure-JAX reference using the same bf16-operand / f32-accumulate math."""
    w1, b1, w2, b2, w3, b3, w4, b4 = prepared
    bf16 = lambda a: a.astype(jnp.bfloat16)
    dot = lambda a, w: jnp.dot(bf16(a), w, preferred_element_type=jnp.float32)
    h = jnp.maximum(dot(x, w1) + b1, 0.0)
    z = jnp.maximum(dot(h, w2) + b2, 0.0)
    d = jnp.maximum(dot(z, w3) + b3, 0.0)
    return jax.nn.sigmoid(dot(d, w4) + b4)


if __name__ == "__main__":
    key = jax.random.PRNGKey(0)
    kx, kp = jax.random.split(key)
    x = jax.random.normal(kx, (B, D_IN), jnp.float32)
    params = prepare_params(init_params(kp))

    out = autoencoder_forward(x, params)
    out = jax.block_until_ready(out)

    ref = reference_forward(x, params)
    assert out.shape == (B, D_IN)
    err = float(jnp.max(jnp.abs(out - ref)))
    assert err < 2e-3, f"mismatch vs pure-JAX reference: {err}"

    print("KERNEL_OK")
</pallas_src>

<mosaic_0001>
module attributes {stable_mosaic.version = 11 : i64} {
  func.func @autoencoder_kernel(%arg0: i32, %arg1: memref<8x256xf32, #tpu.memory_space<vmem>>, %arg2: memref<256x128xbf16, #tpu.memory_space<vmem>>, %arg3: memref<1x128xf32, #tpu.memory_space<vmem>>, %arg4: memref<128x32xbf16, #tpu.memory_space<vmem>>, %arg5: memref<1x32xf32, #tpu.memory_space<vmem>>, %arg6: memref<32x128xbf16, #tpu.memory_space<vmem>>, %arg7: memref<1x128xf32, #tpu.memory_space<vmem>>, %arg8: memref<128x256xbf16, #tpu.memory_space<vmem>>, %arg9: memref<1x256xf32, #tpu.memory_space<vmem>>, %arg10: memref<8x256xf32, #tpu.memory_space<vmem>>) attributes {dimension_semantics = [#tpu.dimension_semantics<parallel>], iteration_bounds = array<i64: 1>, scalar_prefetch = 0 : i64, scratch_operands = 0 : i64, tpu.core_type = #tpu.core_type<tc>, window_params = [{transform_indices = @transform_0, window_bounds = array<i64: 8, 256>}, {pipeline_mode = #tpu.pipeline_mode<synchronous>, transform_indices = @transform_1, window_bounds = array<i64: 256, 128>}, {pipeline_mode = #tpu.pipeline_mode<synchronous>, transform_indices = @transform_2, window_bounds = array<i64: 1, 128>}, {pipeline_mode = #tpu.pipeline_mode<synchronous>, transform_indices = @transform_3, window_bounds = array<i64: 128, 32>}, {pipeline_mode = #tpu.pipeline_mode<synchronous>, transform_indices = @transform_4, window_bounds = array<i64: 1, 32>}, {pipeline_mode = #tpu.pipeline_mode<synchronous>, transform_indices = @transform_5, window_bounds = array<i64: 32, 128>}, {pipeline_mode = #tpu.pipeline_mode<synchronous>, transform_indices = @transform_6, window_bounds = array<i64: 1, 128>}, {pipeline_mode = #tpu.pipeline_mode<synchronous>, transform_indices = @transform_7, window_bounds = array<i64: 128, 256>}, {pipeline_mode = #tpu.pipeline_mode<synchronous>, transform_indices = @transform_8, window_bounds = array<i64: 1, 256>}, {transform_indices = @transform_9, window_bounds = array<i64: 8, 256>}]} {
    %c0 = arith.constant 0 : index
    %c0_0 = arith.constant 0 : index
    %0 = vector.load %arg1[%c0, %c0_0] : memref<8x256xf32, #tpu.memory_space<vmem>>, vector<8x256xf32>
    %1 = arith.truncf %0 : vector<8x256xf32> to vector<8x256xbf16>
    %c0_1 = arith.constant 0 : index
    %c0_2 = arith.constant 0 : index
    %2 = vector.load %arg2[%c0_1, %c0_2] : memref<256x128xbf16, #tpu.memory_space<vmem>>, vector<256x128xbf16>
    %cst = arith.constant dense<0.000000e+00> : vector<8x128xf32>
    %3 = tpu.matmul %1, %2, %cst {dimension_numbers = #tpu.dot_dimension_numbers<[1], [0], [0], [1], [0, 0, 1, 1], [], []>} : vector<8x256xbf16>, vector<256x128xbf16>, vector<8x128xf32> -> vector<8x128xf32>
    %c0_3 = arith.constant 0 : index
    %c0_4 = arith.constant 0 : index
    %4 = vector.load %arg3[%c0_3, %c0_4] : memref<1x128xf32, #tpu.memory_space<vmem>>, vector<1x128xf32>
    %5 = vector.broadcast %4 : vector<1x128xf32> to vector<8x128xf32>
    %6 = arith.addf %3, %5 : vector<8x128xf32>
    %cst_5 = arith.constant 0.000000e+00 : f32
    %7 = vector.broadcast %cst_5 : f32 to vector<8x128xf32>
    %8 = arith.maximumf %6, %7 : vector<8x128xf32>
    %9 = arith.truncf %8 : vector<8x128xf32> to vector<8x128xbf16>
    %c0_6 = arith.constant 0 : index
    %c0_7 = arith.constant 0 : index
    %10 = vector.load %arg4[%c0_6, %c0_7] : memref<128x32xbf16, #tpu.memory_space<vmem>>, vector<128x32xbf16>
    %cst_8 = arith.constant dense<0.000000e+00> : vector<8x32xf32>
    %11 = tpu.matmul %9, %10, %cst_8 {dimension_numbers = #tpu.dot_dimension_numbers<[1], [0], [0], [1], [0, 0, 1, 1], [], []>} : vector<8x128xbf16>, vector<128x32xbf16>, vector<8x32xf32> -> vector<8x32xf32>
    %c0_9 = arith.constant 0 : index
    %c0_10 = arith.constant 0 : index
    %12 = vector.load %arg5[%c0_9, %c0_10] : memref<1x32xf32, #tpu.memory_space<vmem>>, vector<1x32xf32>
    %13 = vector.broadcast %12 : vector<1x32xf32> to vector<8x32xf32>
    %14 = arith.addf %11, %13 : vector<8x32xf32>
    %cst_11 = arith.constant 0.000000e+00 : f32
    %15 = vector.broadcast %cst_11 : f32 to vector<8x32xf32>
    %16 = arith.maximumf %14, %15 : vector<8x32xf32>
    %17 = arith.truncf %16 : vector<8x32xf32> to vector<8x32xbf16>
    %c0_12 = arith.constant 0 : index
    %c0_13 = arith.constant 0 : index
    %18 = vector.load %arg6[%c0_12, %c0_13] : memref<32x128xbf16, #tpu.memory_space<vmem>>, vector<32x128xbf16>
    %cst_14 = arith.constant dense<0.000000e+00> : vector<8x128xf32>
    %19 = tpu.matmul %17, %18, %cst_14 {dimension_numbers = #tpu.dot_dimension_numbers<[1], [0], [0], [1], [0, 0, 1, 1], [], []>} : vector<8x32xbf16>, vector<32x128xbf16>, vector<8x128xf32> -> vector<8x128xf32>
    %c0_15 = arith.constant 0 : index
    %c0_16 = arith.constant 0 : index
    %20 = vector.load %arg7[%c0_15, %c0_16] : memref<1x128xf32, #tpu.memory_space<vmem>>, vector<1x128xf32>
    %21 = vector.broadcast %20 : vector<1x128xf32> to vector<8x128xf32>
    %22 = arith.addf %19, %21 : vector<8x128xf32>
    %cst_17 = arith.constant 0.000000e+00 : f32
    %23 = vector.broadcast %cst_17 : f32 to vector<8x128xf32>
    %24 = arith.maximumf %22, %23 : vector<8x128xf32>
    %25 = arith.truncf %24 : vector<8x128xf32> to vector<8x128xbf16>
    %c0_18 = arith.constant 0 : index
    %c0_19 = arith.constant 0 : index
    %26 = vector.load %arg8[%c0_18, %c0_19] : memref<128x256xbf16, #tpu.memory_space<vmem>>, vector<128x256xbf16>
    %cst_20 = arith.constant dense<0.000000e+00> : vector<8x256xf32>
    %27 = tpu.matmul %25, %26, %cst_20 {dimension_numbers = #tpu.dot_dimension_numbers<[1], [0], [0], [1], [0, 0, 1, 1], [], []>} : vector<8x128xbf16>, vector<128x256xbf16>, vector<8x256xf32> -> vector<8x256xf32>
    %c0_21 = arith.constant 0 : index
    %c0_22 = arith.constant 0 : index
    %28 = vector.load %arg9[%c0_21, %c0_22] : memref<1x256xf32, #tpu.memory_space<vmem>>, vector<1x256xf32>
    %29 = vector.broadcast %28 : vector<1x256xf32> to vector<8x256xf32>
    %30 = arith.addf %27, %29 : vector<8x256xf32>
    %cst_23 = arith.constant 0.000000e+00 : f32
    %31 = vector.broadcast %cst_23 : f32 to vector<8x256xf32>
    %32 = arith.subf %31, %30 : vector<8x256xf32>
    %33 = math.exp %32 : vector<8x256xf32>
    %cst_24 = arith.constant 1.000000e+00 : f32
    %34 = vector.broadcast %cst_24 : f32 to vector<8x256xf32>
    %35 = arith.addf %34, %33 : vector<8x256xf32>
    %36 = tpu.reciprocal %35 {approx = true} : vector<8x256xf32> -> vector<8x256xf32>
    %c0_25 = arith.constant 0 : index
    %c0_26 = arith.constant 0 : index
    %37 = vector.load %arg10[%c0_25, %c0_26] : memref<8x256xf32, #tpu.memory_space<vmem>>, vector<8x256xf32>
    tpu.vector_store %arg10[%c0_25, %c0_26], %36 {strides = array<i32>} : memref<8x256xf32, #tpu.memory_space<vmem>>, vector<8x256xf32>,
    return
  }
  func.func @transform_0(%arg0: i32) -> (i32, i32) {
    %c0_i32 = arith.constant 0 : i32
    %c0_i32_0 = arith.constant 0 : i32
    return %arg0, %c0_i32 : i32, i32
  }
  func.func @transform_1(%arg0: i32) -> (i32, i32) {
    %c0_i32 = arith.constant 0 : i32
    %c0_i32_0 = arith.constant 0 : i32
    %c0_i32_1 = arith.constant 0 : i32
    return %c0_i32, %c0_i32_0 : i32, i32
  }
  func.func @transform_2(%arg0: i32) -> (i32, i32) {
    %c0_i32 = arith.constant 0 : i32
    %c0_i32_0 = arith.constant 0 : i32
    %c0_i32_1 = arith.constant 0 : i32
    return %c0_i32, %c0_i32_0 : i32, i32
  }
  func.func @transform_3(%arg0: i32) -> (i32, i32) {
    %c0_i32 = arith.constant 0 : i32
    %c0_i32_0 = arith.constant 0 : i32
    %c0_i32_1 = arith.constant 0 : i32
    return %c0_i32, %c0_i32_0 : i32, i32
  }
  func.func @transform_4(%arg0: i32) -> (i32, i32) {
    %c0_i32 = arith.constant 0 : i32
    %c0_i32_0 = arith.constant 0 : i32
    %c0_i32_1 = arith.constant 0 : i32
    return %c0_i32, %c0_i32_0 : i32, i32
  }
  func.func @transform_5(%arg0: i32) -> (i32, i32) {
    %c0_i32 = arith.constant 0 : i32
    %c0_i32_0 = arith.constant 0 : i32
    %c0_i32_1 = arith.constant 0 : i32
    return %c0_i32, %c0_i32_0 : i32, i32
  }
  func.func @transform_6(%arg0: i32) -> (i32, i32) {
    %c0_i32 = arith.constant 0 : i32
    %c0_i32_0 = arith.constant 0 : i32
    %c0_i32_1 = arith.constant 0 : i32
    return %c0_i32, %c0_i32_0 : i32, i32
  }
  func.func @transform_7(%arg0: i32) -> (i32, i32) {
    %c0_i32 = arith.constant 0 : i32
    %c0_i32_0 = arith.constant 0 : i32
    %c0_i32_1 = arith.constant 0 : i32
    return %c0_i32, %c0_i32_0 : i32, i32
  }
  func.func @transform_8(%arg0: i32) -> (i32, i32) {
    %c0_i32 = arith.constant 0 : i32
    %c0_i32_0 = arith.constant 0 : i32
    %c0_i32_1 = arith.constant 0 : i32
    return %c0_i32, %c0_i32_0 : i32, i32
  }
  func.func @transform_9(%arg0: i32) -> (i32, i32) {
    %c0_i32 = arith.constant 0 : i32
    %c0_i32_0 = arith.constant 0 : i32
    return %arg0, %c0_i32 : i32, i32
  }
}

</mosaic_0001>

<bundles_post_ra>
// kernel: _forward_impl.1
= control target key start
LH: loop header
LB: loop body
LE: loop exit
PB: predicated region body
PF: predicated region fallthrough
CT: control target
= control target key end

     0   :  { %14 = vsyncpa [#allocation3], 0  ;;  %s931_s0 = inlined_call_operand.vmem [shape: f32[8,256], index: 0, kind: input, shape index: {}]   ;;  %s932_s1 = inlined_call_operand.hbm [shape: bf16[256,128], index: 1, kind: input, shape index: {}]   ;;  %s933_s2 = inlined_call_operand.vmem [shape: f32[1,128], index: 2, kind: input, shape index: {}]   ;;  %s934_s3 = inlined_call_operand.vmem [shape: bf16[128,32], index: 3, kind: input, shape index: {}]   ;;  %s935_s4 = inlined_call_operand.vmem [shape: f32[1,32], index: 4, kind: input, shape index: {}]   ;;  %s936_s5 = inlined_call_operand.vmem [shape: bf16[32,128], index: 5, kind: input, shape index: {}]   ;;  %s937_s6 = inlined_call_operand.vmem [shape: f32[1,128], index: 6, kind: input, shape index: {}]   ;;  %s938_s7 = inlined_call_operand.hbm [shape: bf16[128,256], index: 7, kind: input, shape index: {}]   ;;  %s939_s8 = inlined_call_operand.vmem [shape: f32[1,256], index: 8, kind: input, shape index: {}]   ;;  %s940_s9 = inlined_call_operand.hbm [shape: f32[8,256], index: 9, kind: output, shape index: {}]  }
   0x1   :  { %15 = vsyncpa [#allocation6], 0 }
   0x2   :  { %16 = vsyncpa [#allocation4], 0  ;;  %s23_s11 = sshll.u32 %s932_s1, 4  ;;  %s817_s12 = smov [#allocation2]   ;;  %s24_s11 = int_to_ptr.hbm [resolvable:$true] %s23_s11 }
   0x3   :  { %s25_s13 = sshll.u32 %s817_s12, 4  ;;  %s46_s16 = sshll.u32 %s938_s7, 4  ;;  %s26_s13 = int_to_ptr.vmem [resolvable:$true] %s25_s13  ;;  %s47_s16 = int_to_ptr.hbm [resolvable:$true] %s46_s16 }
   0x4   :  { %s818_s17 = smov 64   ;;  %s819_s18 = smov 4  }
   0x5   :  { %31 = dma.hbm_to_vmem [thread:$0]  %s24_s11, 2048, %s26_s13, [#allocation3], %s818_s17, %s818_s17, %s819_s18  }
   0x6   :  { %s820_s19 = smov [#allocation5]   ;;  %s821_s21 = smov 128  }
   0x7   :  { %s48_s20 = sshll.u32 %s820_s19, 4  ;;  %s822_s22 = smov 8   ;;  %s49_s20 = int_to_ptr.vmem [resolvable:$true] %s48_s20 }
   0x8   :  { %54 = dma.hbm_to_vmem [thread:$0]  %s47_s16, 2048, %s49_s20, [#allocation6], %s821_s21, %s821_s21, %s822_s22  }
   0x9   :  { %811 = dma.done.wait [#allocation3], 2048  }
   0xa   :  { %812 = vsyncadd [#allocation3], 4294965248 }
   0xb   :  { %813 = dma.done.wait [#allocation6], 2048  }
   0xc   :  { %814 = vsyncadd [#allocation6], 4294965248  ;;  %v686_v0 = vld [vmem:[#allocation2 + $0x38] sm:$0xff]  ;;  %v685_v2 = vld [vmem:[#allocation2 + $0x30] sm:$0xff]  ;;  %vm333_vm0 = vcmask 261120   ;;  %s499_s27 = sshll.u32 %s940_s9, 4  ;;  %s500_s27 = int_to_ptr.hbm [resolvable:$true] %s499_s27 }
   0xd   :  { %v694_v1 = vld [vmem:[#allocation2 + $0x78] sm:$0xff]  ;;  %202 = vmatpush.bf16.msra.mxu0 %v686_v0  ;;  %v693_v3 = vld [vmem:[#allocation2 + $0x70] sm:$0xff]  ;;  %v684_v4 = vld [vmem:[#allocation2 + $0x28] sm:$0xff] }
   0xe   :  { %215 = vmatpush.bf16.msra.mxu1 %v694_v1  ;;  %v692_v5 = vld [vmem:[#allocation2 + $0x68] sm:$0xff]  ;;  %v702_v6 = vld [vmem:[%s934_s3 + $0x38] sm:$0xff]  ;;  %v701_v7 = vld [vmem:[%s934_s3 + $0x30] sm:$0xff] }
   0xf   :  { %298 = vmatpush.bf16.msra.mxu2 %v702_v6  ;;  %v683_v8 = vld [vmem:[#allocation2 + $0x20] sm:$0xff]  ;;  %v700_v10 = vld [vmem:[%s934_s3 + $0x28] sm:$0xff]  ;;  %v682_v11 = vld [vmem:[#allocation2 + $0x18] sm:$0xff] }
  0x10   :  { %v691_v9 = vld [vmem:[#allocation2 + $0x60] sm:$0xff]  ;;  %v690_v12 = vld [vmem:[#allocation2 + $0x58] sm:$0xff]  ;;  %v681_v14 = vld [vmem:[#allocation2 + $0x10] sm:$0xff] }
  0x11   :  { %203 = vmatpush.bf16.msra.mxu0 %v685_v2  ;;  %v699_v13 = vld [vmem:[%s934_s3 + $0x20] sm:$0xff]  ;;  %v689_v15 = vld [vmem:[#allocation2 + $0x50] sm:$0xff]  ;;  %v698_v16 = vld [vmem:[%s934_s3 + $0x18] sm:$0xff] }
  0x12   :  { %216 = vmatpush.bf16.msra.mxu1 %v693_v3  ;;  %v680_v17 = vld [vmem:[#allocation2 + $0x8] sm:$0xff]  ;;  %v697_v19 = vld [vmem:[%s934_s3 + $0x10] sm:$0xff]  ;;  %v679_v20 = vld [vmem:[#allocation2] sm:$0xff] }
  0x13   :  { %299 = vmatpush.bf16.msra.mxu2 %v701_v7  ;;  %v688_v18 = vld [vmem:[#allocation2 + $0x48] sm:$0xff]  ;;  %v687_v21 = vld [vmem:[#allocation2 + $0x40] sm:$0xff]  ;;  %v673_v39 = vld [vmem:[#allocation5 + $0x70] sm:$0xf] }
  0x14   :  { %v66_v22 = vld [vmem:[%s931_s0] sm:$0xff]  ;;  %v67_v23 = vld [vmem:[%s931_s0 + $0x8] sm:$0xff]  ;;  %v720_v40 = vld [vmem:[#allocation5 + $0x74] sm:$0xf0] }
  0x15   :  { %204 = vmatpush.bf16.msra.mxu0 %v684_v4  ;;  %v68_v24 = vpack.c.bf16 %v66_v22, %v66_v22  ;;  %v69_v25 = vpack.c.bf16 %v67_v23, %v67_v23  ;;  %v696_v26 = vld [vmem:[%s934_s3 + $0x8] sm:$0xff]  ;;  %v695_v27 = vld [vmem:[%s934_s3] sm:$0xff]  ;;  %v719_v41 = vld [vmem:[#allocation5 + $0x74] sm:$0xf]  ;;  %v674_v42 = vor.u32 %v720_v40, %v673_v39 }
  0x16   :  { %217 = vmatpush.bf16.msra.mxu1 %v692_v5  ;;  %v728_v28 = vld [vmem:[%s933_s2] ss:$0 sm:$0xff]  ;;  %v704_v37 = vld [vmem:[%s936_s5 + $0x8] sm:$0xff]  ;;  %v675_v43 = vld [vmem:[#allocation5 + $0x78] sm:$0xf0] }
  0x17   :  { %300 = vmatpush.bf16.msra.mxu2 %v700_v10  ;;  %343 = vmatpush.bf16.msra.mxu3 %v704_v37  ;;  %v703_v38 = vld [vmem:[%s936_s5] sm:$0xff]  ;;  %v718_v45 = vld [vmem:[#allocation5 + $0x64] sm:$0xf0]  ;;  %v678_v46 = vor.u32 %v719_v41, %v675_v43  ;;  %v667_v48 = vld [vmem:[#allocation5 + $0x68] sm:$0xf0] }
  0x18   :  { %v665_v44 = vld [vmem:[#allocation5 + $0x60] sm:$0xf]  ;;  %v717_v47 = vld [vmem:[#allocation5 + $0x64] sm:$0xf]  ;;  %v657_v51 = vld [vmem:[#allocation5 + $0x50] sm:$0xf] }
  0x19   :  { %205 = vmatpush.bf16.msra.mxu0 %v683_v8  ;;  %v666_v49 = vor.u32 %v718_v45, %v665_v44  ;;  %v670_v50 = vor.u32 %v717_v47, %v667_v48  ;;  %v716_v52 = vld [vmem:[#allocation5 + $0x54] sm:$0xf0]  ;;  %v715_v53 = vld [vmem:[#allocation5 + $0x54] sm:$0xf]  ;;  %v659_v54 = vld [vmem:[#allocation5 + $0x58] sm:$0xf0] }
  0x1a   :  { %218 = vmatpush.bf16.msra.mxu1 %v691_v9  ;;  %v658_v55 = vor.u32 %v716_v52, %v657_v51  ;;  %v662_v56 = vor.u32 %v715_v53, %v659_v54  ;;  %v649_v57 = vld [vmem:[#allocation5 + $0x40] sm:$0xf]  ;;  %v714_v58 = vld [vmem:[#allocation5 + $0x44] sm:$0xf0]  ;;  %v713_v59 = vld [vmem:[#allocation5 + $0x44] sm:$0xf] }
  0x1b   :  { %301 = vmatpush.bf16.msra.mxu2 %v699_v13  ;;  %344 = vmatpush.bf16.msra.mxu3 %v703_v38  ;;  %v651_v60 = vld [vmem:[#allocation5 + $0x48] sm:$0xf0]  ;;  %v650_v61 = vor.u32 %v714_v58, %v649_v57  ;;  %v641_v63 = vld [vmem:[#allocation5 + $0x30] sm:$0xf]  ;;  %v712_v0 = vld [vmem:[#allocation5 + $0x34] sm:$0xf0] }
  0x1c   :  { %v654_v62 = vor.u32 %v713_v59, %v651_v60  ;;  %v711_v1 = vld [vmem:[#allocation5 + $0x34] sm:$0xf]  ;;  %v643_v2 = vld [vmem:[#allocation5 + $0x38] sm:$0xf0]  ;;  %v642_v3 = vor.u32 %v712_v0, %v641_v63  ;;  %v633_v5 = vld [vmem:[#allocation5 + $0x20] sm:$0xf] }
  0x1d   :  { %206 = vmatpush.bf16.msra.mxu0 %v682_v11  ;;  %v646_v4 = vor.u32 %v711_v1, %v643_v2  ;;  %v710_v6 = vld [vmem:[#allocation5 + $0x24] sm:$0xf0]  ;;  %v709_v7 = vld [vmem:[#allocation5 + $0x24] sm:$0xf]  ;;  %v635_v8 = vld [vmem:[#allocation5 + $0x28] sm:$0xf0] }
  0x1e   :  { %219 = vmatpush.bf16.msra.mxu1 %v690_v12  ;;  %v634_v9 = vor.u32 %v710_v6, %v633_v5  ;;  %v638_v10 = vor.u32 %v709_v7, %v635_v8  ;;  %v729_v11 = vld [vmem:[%s935_s4] ss:$0 sm:$0xff] }
  0x1f   :  { %302 = vmatpush.bf16.msra.mxu2 %v698_v16  ;;  %454 = vmatpush.bf16.msrb.mxu3 %v674_v42  ;;  %v617_v23 = vld [vmem:[#allocation5] sm:$0xf] }
  0x21   :  { %207 = vmatpush.bf16.msra.mxu0 %v681_v14 }
  0x22   :  { %220 = vmatpush.bf16.msra.mxu1 %v689_v15 }
  0x23   :  { %303 = vmatpush.bf16.msra.mxu2 %v697_v19  ;;  %455 = vmatpush.bf16.msrb.mxu3 %v666_v49  ;;  %v707_v19 = vld [vmem:[#allocation5 + $0x14] sm:$0xf] }
  0x25   :  { %208 = vmatpush.bf16.msra.mxu0 %v680_v17  ;;  %v625_v17 = vld [vmem:[#allocation5 + $0x10] sm:$0xf] }
  0x26   :  { %221 = vmatpush.bf16.msra.mxu1 %v688_v18  ;;  %v708_v18 = vld [vmem:[#allocation5 + $0x14] sm:$0xf0] }
  0x27   :  { %304 = vmatpush.bf16.msra.mxu2 %v696_v26  ;;  %456 = vmatpush.bf16.msrb.mxu3 %v658_v55 }
  0x29   :  { %209 = vmatpush.bf16.msra.mxu0 %v679_v20  ;;  %v626_v20 = vor.u32 %v708_v18, %v625_v17 }
  0x2a   :  { %222 = vmatpush.bf16.msra.mxu1 %v687_v21  ;;  %v627_v21 = vld [vmem:[#allocation5 + $0x18] sm:$0xf0] }
  0x2b   :  { %305 = vmatpush.bf16.msra.mxu2 %v695_v27  ;;  %457 = vmatpush.bf16.msrb.mxu3 %v650_v61  ;;  %v630_v22 = vor.u32 %v707_v19, %v627_v21  ;;  %v619_v27 = vld [vmem:[#allocation5 + $0x8] sm:$0xf0] }
  0x2c   :  { %210 = vmatmul.bf16.vlgmr.msra.gmra.mxu0 %v68_v24  ;;  %v706_v24 = vld [vmem:[#allocation5 + $0x4] sm:$0xf0] }
  0x2d   :  { %223 = vmatmul.bf16.vlgmr.msra.gmra.mxu1 %v69_v25  ;;  %467 = vmatpush.bf16.msrb.mxu0 %v678_v46  ;;  %v705_v25 = vld [vmem:[#allocation5 + $0x4] sm:$0xf]  ;;  %v618_v26 = vor.u32 %v706_v24, %v617_v23 }
  0x2f   :  { %458 = vmatpush.bf16.msrb.mxu3 %v642_v3 }
  0x31   :  { %468 = vmatpush.bf16.msrb.mxu0 %v670_v50 }
  0x33   :  { %459 = vmatpush.bf16.msrb.mxu3 %v634_v9 }
  0x35   :  { %469 = vmatpush.bf16.msrb.mxu0 %v662_v56 }
  0x37   :  { %460 = vmatpush.bf16.msrb.mxu3 %v626_v20 }
  0x39   :  { %470 = vmatpush.bf16.msrb.mxu0 %v654_v62 }
  0x3b   :  { %461 = vmatpush.bf16.msrb.mxu3 %v618_v26 }
  0x3d   :  { %471 = vmatpush.bf16.msrb.mxu0 %v646_v4 }
  0x41   :  { %472 = vmatpush.bf16.msrb.mxu0 %v638_v10 }
  0x45   :  { %473 = vmatpush.bf16.msrb.mxu0 %v630_v22 }
  0xa9   :  { %v211_v29 = vpop.f32.mrf.mxu0 }
  0xaa   :  { %v224_v30 = vpop.f32.mrf.mxu1  ;;  %v212_v31 = vadd.f32 %v728_v28, %v211_v29  ;;  %v622_v28 = vor.u32 %v705_v25, %v619_v27  ;;  %v730_v29 = vld [vmem:[%s937_s6] ss:$0 sm:$0xff]  ;;  %s823_s6 = smov [#allocation7]  }
  0xac   :  { %v225_v32 = vadd.f32 %v224_v30, %v212_v31  ;;  %474 = vmatpush.bf16.msrb.mxu0 %v622_v28 }
  0xae   :  { %v228_v33 = vmax.f32 %v225_v32, 0.0 }
  0xb0   :  { %v229_v34 = vpack.c.bf16 %v228_v33, %v228_v33 }
  0xb1   :  { %v213_v35 = vpop.f32.mrf.mxu0 }
  0xb2   :  { %v226_v36 = vpop.f32.mrf.mxu1  ;;  %306 = vmatmul.bf16.vlgmr.msra.gmra.mxu2 %v229_v34  ;;  %v368_v35 = vld [vmem:[%s939_s8] sm:$0x3]  ;;  %s497_s8 = sshll.u32 %s823_s6, 4  ;;  %s498_s8 = int_to_ptr.vmem [resolvable:$true] %s497_s8 }
  0xb3   :  { %v371_v36 = vperm.slane %v368_v35, 1  ;;  %v370_v40 = vperm.slane %v368_v35, 0 }
 0x135   :  { %v307_v12 = vpop.f32.mrf.mxu2 }
 0x136   :  { %v308_v13 = vadd.f32 %v729_v11, %v307_v12 }
 0x138   :  { %v311_v14 = vmax.f32 %v308_v13, 0.0 }
 0x13a   :  { %v312_v15 = vpack.c.bf16 %v311_v14, %v311_v14 }
 0x13c   :  { %614 = vmatmul.msk.bf16.vlgmr.msra.gmra.mxu3 %vm333_vm0, %v312_v15 }
 0x13d   :  { %v309_v16 = vpop.f32.mrf.mxu2 }
 0x1bf   :  { %v346_v30 = vpop.f32.mrf.mxu3 }
 0x1c0   :  { %v347_v31 = vadd.f32 %v730_v29, %v346_v30 }
 0x1c2   :  { %v350_v32 = vmax.f32 %v347_v31, 0.0 }
 0x1c4   :  { %v351_v33 = vpack.c.bf16 %v350_v32, %v350_v32 }
 0x1c6   :  { %462 = vmatmul.bf16.vlgmr.msrb.gmra.mxu3 %v351_v33  ;;  %475 = vmatmul.bf16.vlgmr.msrb.gmra.mxu0 %v351_v33 }
 0x1c7   :  { %v348_v34 = vpop.f32.mrf.mxu3 }
 0x243   :  { %v476_v37 = vpop.f32.mrf.mxu0 }
 0x244   :  { %v477_v38 = vadd.f32 %v476_v37, %v371_v36 }
 0x246   :  { %v481_v39 = vsub.f32 0.0, %v477_v38 }
 0x248   :  { %v484_v41 = vmul.f32 1.442695, %v481_v39 }
 0x249   :  { %v463_v42 = vpop.f32.mrf.mxu3 }
 0x24a   :  { %731 = vpow2.f32 %v484_v41  ;;  %v464_v43 = vadd.f32 %v463_v42, %v370_v40 }
 0x24b   :  { %v478_v44 = vpop.f32.mrf.mxu0 }
 0x24c   :  { %v480_v45 = vsub.f32 0.0, %v464_v43 }
 0x24e   :  { %v482_v46 = vmul.f32 1.442695, %v480_v45 }
 0x250   :  { %v732_v47 = vpop.eup %731  ;;  %733 = vpow2.f32 %v482_v46 }
 0x251   :  { %v487_v48 = vadd.f32 1.0, %v732_v47  ;;  %v465_v49 = vpop.f32.mrf.mxu3 }
 0x253   :  { %735 = vrcp.f32 %v487_v48 }
 0x256   :  { %v734_v50 = vpop.eup %733 }
 0x257   :  { %v486_v51 = vadd.f32 1.0, %v734_v50 }
 0x259   :  { %v736_v52 = vpop.eup %735  ;;  %737 = vrcp.f32 %v486_v51 }
 0x25a   :  { %491 = vst [vmem:[#allocation7 + $0x8] sm:$0xff] %v736_v52 }
 0x25f   :  { %v738_v53 = vpop.eup %737 }
 0x260   :  { %490 = vst [vmem:[#allocation7] sm:$0xff] %v738_v53 }
 0x261   :  { %502 = dma.vmem_to_hbm [thread:$0]  %s498_s8, 256, %s500_s27, [#allocation4]  }
 0x262   :  { %815 = dma.done.wait [#allocation4], 256  }
 0x263   :  { %816 = vsyncadd [#allocation4], 4294967040 }
 0x264   :  { %507 = vsyncpa [#allocation3], 1 }
 0x265   :  { %508 = vsyncpa [#allocation6], 1 }
 0x266   :  { %509 = vsyncpa [#allocation4], 1 }

</bundles_post_ra>
